<compile_context>
chip_gen: v6e
topology: v6e:2x2x1
jax: 0.10.0
libtpu: 0.0.40
codegen_flags: <defaults>
</compile_context>

<pallas_src>
import jax
import jax.numpy as jnp
from jax.experimental import pallas as pl
from jax.experimental.pallas import tpu as pltpu

LANE = 128
SUBLANE = 8


def _round_up(x, m):
    return ((x + m - 1) // m) * m


def _mlp_kernel(x_ref, w1_ref, b1_ref, w2_ref, b2_ref, o_ref):
    # x.to(torch.float32)
    x = x_ref[...].astype(jnp.float32)
    # Linear(in_features, in_features // 16) + ReLU
    h = jnp.dot(x, w1_ref[...], preferred_element_type=jnp.float32) + b1_ref[...]
    h = jnp.maximum(h, 0.0)
    # Linear(in_features // 16, n_classes)  (N padded to a lane multiple of 128)
    o_ref[...] = (jnp.dot(h, w2_ref[...], preferred_element_type=jnp.float32)
                  + b2_ref[...]).astype(o_ref.dtype)


def middle_model_forward(x, w1, b1, w2, b2, *, tb=None):
    """Fused MLP forward. x: (B, in_features). Returns (B, n_classes) float32.

    Weights are stored (in, out); kernel computes relu(x @ W1 + b1) @ W2 + b2.
    """
    B, in_features = x.shape
    hidden = w1.shape[1]
    n_classes = w2.shape[1]

    # ---- lane-dense output: pad N (n_classes) up to a multiple of 128 with zeros ----
    n_pad = _round_up(max(n_classes, LANE), LANE)
    w2_p = jnp.zeros((hidden, n_pad), jnp.float32).at[:, :n_classes].set(
        w2.astype(jnp.float32))
    b2_p = jnp.zeros((1, n_pad), jnp.float32).at[:, :n_classes].set(
        b2.astype(jnp.float32).reshape(1, n_classes))
    b1_2d = b1.astype(jnp.float32).reshape(1, hidden)
    w1_f32 = w1.astype(jnp.float32)

    # ---- batch tile: big tiles amortize ~0.35us/step pipeline overhead.
    # tb=1024 -> x tile is 2 MiB f32 (4 MiB double-buffered) + 0.5 MiB out tile:
    # comfortably inside the default scoped VMEM on v5e/v6e/v7x.
    if tb is None:
        tb = min(1024, _round_up(B, SUBLANE))
    tb = max(SUBLANE, _round_up(tb, SUBLANE))

    # ---- handle batch remainders by zero-padding instead of asserting divisibility ----
    B_pad = _round_up(B, tb)
    if B_pad != B:
        x = jnp.pad(x, ((0, B_pad - B), (0, 0)))

    grid = (B_pad // tb,)
    out_padded = pl.pallas_call(
        _mlp_kernel,
        out_shape=jax.ShapeDtypeStruct((B_pad, n_pad), jnp.float32),
        grid_spec=pltpu.PrefetchScalarGridSpec(
            num_scalar_prefetch=0,
            grid=grid,
            in_specs=[
                pl.BlockSpec((tb, in_features), lambda i: (i, 0)),        # x tile
                pl.BlockSpec((in_features, hidden), lambda i: (0, 0)),    # W1 (resident)
                pl.BlockSpec((1, hidden), lambda i: (0, 0)),              # b1
                pl.BlockSpec((hidden, n_pad), lambda i: (0, 0)),          # W2 (padded N)
                pl.BlockSpec((1, n_pad), lambda i: (0, 0)),               # b2 (padded N)
            ],
            out_specs=pl.BlockSpec((tb, n_pad), lambda i: (i, 0)),
        ),
        compiler_params=pltpu.CompilerParams(
            dimension_semantics=("parallel",)),  # on v7x the batch axis shards across both TCs
    )(x, w1_f32, b1_2d, w2_p, b2_p)

    # strip batch padding and the zero-padded class columns
    return out_padded[:B, :n_classes]


def init_params(key, in_features, n_classes):
    """Deterministic init mimicking nn.Linear default (uniform +/- 1/sqrt(fan_in))."""
    hidden = in_features // 16
    k1, k2, k3, k4 = jax.random.split(key, 4)
    lim1 = 1.0 / jnp.sqrt(in_features)
    lim2 = 1.0 / jnp.sqrt(hidden)
    w1 = jax.random.uniform(k1, (in_features, hidden), jnp.float32, -lim1, lim1)
    b1 = jax.random.uniform(k2, (hidden,), jnp.float32, -lim1, lim1)
    w2 = jax.random.uniform(k3, (hidden, n_classes), jnp.float32, -lim2, lim2)
    b2 = jax.random.uniform(k4, (n_classes,), jnp.float32, -lim2, lim2)
    return w1, b1, w2, b2


if __name__ == "__main__":
    key = jax.random.PRNGKey(0)
    kx, kp = jax.random.split(key)

    in_features = 512   # module default (hidden = 512 // 16 = 32)
    n_classes = 10
    batch = 8           # small demo shape; wrapper also handles large / ragged batches

    x = jax.random.normal(kx, (batch, in_features), dtype=jnp.float32)
    w1, b1, w2, b2 = init_params(kp, in_features, n_classes)

    out = middle_model_forward(x, w1, b1, w2, b2)
    out = jax.block_until_ready(out)

    # reference check in plain JAX
    ref = jnp.maximum(x.astype(jnp.float32) @ w1 + b1, 0.0) @ w2 + b2
    assert out.shape == (batch, n_classes)
    assert jnp.allclose(out, ref, atol=1e-4, rtol=1e-4)

    # also exercise a non-divisible batch to verify remainder handling
    xb = jax.random.normal(kx, (13, in_features), dtype=jnp.float32)
    outb = jax.block_until_ready(middle_model_forward(xb, w1, b1, w2, b2))
    refb = jnp.maximum(xb @ w1 + b1, 0.0) @ w2 + b2
    assert outb.shape == (13, n_classes)
    assert jnp.allclose(outb, refb, atol=1e-4, rtol=1e-4)

    print("KERNEL_OK")
</pallas_src>

<mosaic_0001>
module attributes {stable_mosaic.version = 11 : i64} {
  func.func @_mlp_kernel(%arg0: i32, %arg1: memref<8x512xf32, #tpu.memory_space<vmem>>, %arg2: memref<512x32xf32, #tpu.memory_space<vmem>>, %arg3: memref<1x32xf32, #tpu.memory_space<vmem>>, %arg4: memref<32x128xf32, #tpu.memory_space<vmem>>, %arg5: memref<1x128xf32, #tpu.memory_space<vmem>>, %arg6: memref<8x128xf32, #tpu.memory_space<vmem>>) attributes {dimension_semantics = [#tpu.dimension_semantics<parallel>], iteration_bounds = array<i64: 1>, scalar_prefetch = 0 : i64, scratch_operands = 0 : i64, tpu.core_type = #tpu.core_type<tc>, window_params = [{transform_indices = @transform_0, window_bounds = array<i64: 8, 512>}, {pipeline_mode = #tpu.pipeline_mode<synchronous>, transform_indices = @transform_1, window_bounds = array<i64: 512, 32>}, {pipeline_mode = #tpu.pipeline_mode<synchronous>, transform_indices = @transform_2, window_bounds = array<i64: 1, 32>}, {pipeline_mode = #tpu.pipeline_mode<synchronous>, transform_indices = @transform_3, window_bounds = array<i64: 32, 128>}, {pipeline_mode = #tpu.pipeline_mode<synchronous>, transform_indices = @transform_4, window_bounds = array<i64: 1, 128>}, {transform_indices = @transform_5, window_bounds = array<i64: 8, 128>}]} {
    %c0 = arith.constant 0 : index
    %c0_0 = arith.constant 0 : index
    %0 = vector.load %arg1[%c0, %c0_0] : memref<8x512xf32, #tpu.memory_space<vmem>>, vector<8x512xf32>
    %c0_1 = arith.constant 0 : index
    %c0_2 = arith.constant 0 : index
    %1 = vector.load %arg2[%c0_1, %c0_2] : memref<512x32xf32, #tpu.memory_space<vmem>>, vector<512x32xf32>
    %cst = arith.constant dense<0.000000e+00> : vector<8x32xf32>
    %2 = tpu.matmul %0, %1, %cst {dimension_numbers = #tpu.dot_dimension_numbers<[1], [0], [0], [1], [0, 0, 1, 1], [], []>} : vector<8x512xf32>, vector<512x32xf32>, vector<8x32xf32> -> vector<8x32xf32>
    %c0_3 = arith.constant 0 : index
    %c0_4 = arith.constant 0 : index
    %3 = vector.load %arg3[%c0_3, %c0_4] : memref<1x32xf32, #tpu.memory_space<vmem>>, vector<1x32xf32>
    %4 = vector.broadcast %3 : vector<1x32xf32> to vector<8x32xf32>
    %5 = arith.addf %2, %4 : vector<8x32xf32>
    %cst_5 = arith.constant 0.000000e+00 : f32
    %6 = vector.broadcast %cst_5 : f32 to vector<8x32xf32>
    %7 = arith.maximumf %5, %6 : vector<8x32xf32>
    %c0_6 = arith.constant 0 : index
    %c0_7 = arith.constant 0 : index
    %8 = vector.load %arg4[%c0_6, %c0_7] : memref<32x128xf32, #tpu.memory_space<vmem>>, vector<32x128xf32>
    %cst_8 = arith.constant dense<0.000000e+00> : vector<8x128xf32>
    %9 = tpu.matmul %7, %8, %cst_8 {dimension_numbers = #tpu.dot_dimension_numbers<[1], [0], [0], [1], [0, 0, 1, 1], [], []>} : vector<8x32xf32>, vector<32x128xf32>, vector<8x128xf32> -> vector<8x128xf32>
    %c0_9 = arith.constant 0 : index
    %c0_10 = arith.constant 0 : index
    %10 = vector.load %arg5[%c0_9, %c0_10] : memref<1x128xf32, #tpu.memory_space<vmem>>, vector<1x128xf32>
    %11 = vector.broadcast %10 : vector<1x128xf32> to vector<8x128xf32>
    %12 = arith.addf %9, %11 : vector<8x128xf32>
    %c0_11 = arith.constant 0 : index
    %c0_12 = arith.constant 0 : index
    %13 = vector.load %arg6[%c0_11, %c0_12] : memref<8x128xf32, #tpu.memory_space<vmem>>, vector<8x128xf32>
    tpu.vector_store %arg6[%c0_11, %c0_12], %12 {strides = array<i32>} : memref<8x128xf32, #tpu.memory_space<vmem>>, vector<8x128xf32>,
    return
  }
  func.func @transform_0(%arg0: i32) -> (i32, i32) {
    %c0_i32 = arith.constant 0 : i32
    %c0_i32_0 = arith.constant 0 : i32
    return %arg0, %c0_i32 : i32, i32
  }
  func.func @transform_1(%arg0: i32) -> (i32, i32) {
    %c0_i32 = arith.constant 0 : i32
    %c0_i32_0 = arith.constant 0 : i32
    %c0_i32_1 = arith.constant 0 : i32
    return %c0_i32, %c0_i32_0 : i32, i32
  }
  func.func @transform_2(%arg0: i32) -> (i32, i32) {
    %c0_i32 = arith.constant 0 : i32
    %c0_i32_0 = arith.constant 0 : i32
    %c0_i32_1 = arith.constant 0 : i32
    return %c0_i32, %c0_i32_0 : i32, i32
  }
  func.func @transform_3(%arg0: i32) -> (i32, i32) {
    %c0_i32 = arith.constant 0 : i32
    %c0_i32_0 = arith.constant 0 : i32
    %c0_i32_1 = arith.constant 0 : i32
    return %c0_i32, %c0_i32_0 : i32, i32
  }
  func.func @transform_4(%arg0: i32) -> (i32, i32) {
    %c0_i32 = arith.constant 0 : i32
    %c0_i32_0 = arith.constant 0 : i32
    %c0_i32_1 = arith.constant 0 : i32
    return %c0_i32, %c0_i32_0 : i32, i32
  }
  func.func @transform_5(%arg0: i32) -> (i32, i32) {
    %c0_i32 = arith.constant 0 : i32
    %c0_i32_0 = arith.constant 0 : i32
    return %arg0, %c0_i32 : i32, i32
  }
}

</mosaic_0001>

<bundles_post_ra>
// kernel: tpu_custom_call.1
= control target key start
LH: loop header
LB: loop body
LE: loop exit
PB: predicated region body
PF: predicated region fallthrough
CT: control target
= control target key end

     0   :  { %s709_s0 = inlined_call_operand.vmem [shape: f32[8,512], index: 0, kind: input, shape index: {}]   ;;  %s710_s1 = inlined_call_operand.vmem [shape: f32[512,32], index: 1, kind: input, shape index: {}]   ;;  %s711_s2 = inlined_call_operand.vmem [shape: f32[1,32], index: 2, kind: input, shape index: {}]   ;;  %s712_s3 = inlined_call_operand.vmem [shape: f32[32,128], index: 3, kind: input, shape index: {}]   ;;  %s713_s4 = inlined_call_operand.vmem [shape: f32[1,128], index: 4, kind: input, shape index: {}]   ;;  %s714_s5 = inlined_call_operand.hbm [shape: f32[8,128], index: 5, kind: output, shape index: {}]  }
   0x1   :  { %v56_v0 = vld [vmem:[%s710_s1 + $0xf8] sm:$0xff]  ;;  %v55_v4 = vld [vmem:[%s710_s1 + $0xf0] sm:$0xff]  ;;  %v54_v8 = vld [vmem:[%s710_s1 + $0xe8] sm:$0xff] }
   0x2   :  { %v88_v1 = vld [vmem:[%s710_s1 + $0x1f8] sm:$0xff]  ;;  %340 = vmatprep.subr.mxu0 %v56_v0  ;;  %v87_v5 = vld [vmem:[%s710_s1 + $0x1f0] sm:$0xff]  ;;  %v86_v9 = vld [vmem:[%s710_s1 + $0x1e8] sm:$0xff] }
   0x3   :  { %v40_v2 = vld [vmem:[%s710_s1 + $0x78] sm:$0xff]  ;;  %375 = vmatprep.subr.mxu1 %v88_v1  ;;  %v39_v6 = vld [vmem:[%s710_s1 + $0x70] sm:$0xff]  ;;  %v38_v10 = vld [vmem:[%s710_s1 + $0x68] sm:$0xff] }
   0x4   :  { %v72_v3 = vld [vmem:[%s710_s1 + $0x178] sm:$0xff]  ;;  %341 = vmatpush3.msra.mxu0 %v40_v2  ;;  %v71_v7 = vld [vmem:[%s710_s1 + $0x170] sm:$0xff]  ;;  %v70_v11 = vld [vmem:[%s710_s1 + $0x168] sm:$0xff] }
   0x5   :  { %376 = vmatpush3.msra.mxu1 %v72_v3  ;;  %342 = vmatprep.subr.mxu0 %v55_v4  ;;  %v53_v12 = vld [vmem:[%s710_s1 + $0xe0] sm:$0xff]  ;;  %v52_v16 = vld [vmem:[%s710_s1 + $0xd8] sm:$0xff]  ;;  %v51_v20 = vld [vmem:[%s710_s1 + $0xd0] sm:$0xff] }
   0x6   :  { %377 = vmatprep.subr.mxu1 %v87_v5  ;;  %343 = vmatpush3.msra.mxu0 %v39_v6  ;;  %v85_v13 = vld [vmem:[%s710_s1 + $0x1e0] sm:$0xff]  ;;  %v84_v17 = vld [vmem:[%s710_s1 + $0x1d8] sm:$0xff]  ;;  %v83_v21 = vld [vmem:[%s710_s1 + $0x1d0] sm:$0xff] }
   0x7   :  { %378 = vmatpush3.msra.mxu1 %v71_v7  ;;  %344 = vmatprep.subr.mxu0 %v54_v8  ;;  %v37_v14 = vld [vmem:[%s710_s1 + $0x60] sm:$0xff]  ;;  %v36_v18 = vld [vmem:[%s710_s1 + $0x58] sm:$0xff]  ;;  %v35_v22 = vld [vmem:[%s710_s1 + $0x50] sm:$0xff] }
   0x8   :  { %379 = vmatprep.subr.mxu1 %v86_v9  ;;  %v69_v15 = vld [vmem:[%s710_s1 + $0x160] sm:$0xff]  ;;  %345 = vmatpush3.msra.mxu0 %v38_v10  ;;  %v68_v19 = vld [vmem:[%s710_s1 + $0x158] sm:$0xff]  ;;  %v67_v23 = vld [vmem:[%s710_s1 + $0x150] sm:$0xff] }
   0x9   :  { %380 = vmatpush3.msra.mxu1 %v70_v11  ;;  %346 = vmatprep.subr.mxu0 %v53_v12  ;;  %v50_v24 = vld [vmem:[%s710_s1 + $0xc8] sm:$0xff]  ;;  %v49_v28 = vld [vmem:[%s710_s1 + $0xc0] sm:$0xff]  ;;  %v48_v32 = vld [vmem:[%s710_s1 + $0xb8] sm:$0xff] }
   0xa   :  { %381 = vmatprep.subr.mxu1 %v85_v13  ;;  %347 = vmatpush3.msra.mxu0 %v37_v14  ;;  %v82_v25 = vld [vmem:[%s710_s1 + $0x1c8] sm:$0xff]  ;;  %v81_v29 = vld [vmem:[%s710_s1 + $0x1c0] sm:$0xff]  ;;  %v80_v33 = vld [vmem:[%s710_s1 + $0x1b8] sm:$0xff] }
   0xb   :  { %382 = vmatpush3.msra.mxu1 %v69_v15  ;;  %348 = vmatprep.subr.mxu0 %v52_v16  ;;  %v34_v26 = vld [vmem:[%s710_s1 + $0x48] sm:$0xff]  ;;  %v33_v30 = vld [vmem:[%s710_s1 + $0x40] sm:$0xff]  ;;  %v32_v34 = vld [vmem:[%s710_s1 + $0x38] sm:$0xff] }
   0xc   :  { %383 = vmatprep.subr.mxu1 %v84_v17  ;;  %349 = vmatpush3.msra.mxu0 %v36_v18  ;;  %v66_v27 = vld [vmem:[%s710_s1 + $0x148] sm:$0xff]  ;;  %v65_v31 = vld [vmem:[%s710_s1 + $0x140] sm:$0xff]  ;;  %v64_v35 = vld [vmem:[%s710_s1 + $0x138] sm:$0xff] }
   0xd   :  { %384 = vmatpush3.msra.mxu1 %v68_v19  ;;  %350 = vmatprep.subr.mxu0 %v51_v20  ;;  %v47_v36 = vld [vmem:[%s710_s1 + $0xb0] sm:$0xff]  ;;  %v46_v40 = vld [vmem:[%s710_s1 + $0xa8] sm:$0xff]  ;;  %v45_v44 = vld [vmem:[%s710_s1 + $0xa0] sm:$0xff] }
   0xe   :  { %385 = vmatprep.subr.mxu1 %v83_v21  ;;  %351 = vmatpush3.msra.mxu0 %v35_v22  ;;  %v79_v37 = vld [vmem:[%s710_s1 + $0x1b0] sm:$0xff]  ;;  %v78_v41 = vld [vmem:[%s710_s1 + $0x1a8] sm:$0xff]  ;;  %v77_v45 = vld [vmem:[%s710_s1 + $0x1a0] sm:$0xff] }
   0xf   :  { %386 = vmatpush3.msra.mxu1 %v67_v23  ;;  %352 = vmatprep.subr.mxu0 %v50_v24  ;;  %v31_v38 = vld [vmem:[%s710_s1 + $0x30] sm:$0xff]  ;;  %v30_v42 = vld [vmem:[%s710_s1 + $0x28] sm:$0xff]  ;;  %v29_v46 = vld [vmem:[%s710_s1 + $0x20] sm:$0xff] }
  0x10   :  { %387 = vmatprep.subr.mxu1 %v82_v25  ;;  %353 = vmatpush3.msra.mxu0 %v34_v26  ;;  %v63_v39 = vld [vmem:[%s710_s1 + $0x130] sm:$0xff]  ;;  %v62_v43 = vld [vmem:[%s710_s1 + $0x128] sm:$0xff]  ;;  %v61_v47 = vld [vmem:[%s710_s1 + $0x120] sm:$0xff] }
  0x11   :  { %388 = vmatpush3.msra.mxu1 %v66_v27  ;;  %354 = vmatprep.subr.mxu0 %v49_v28  ;;  %v44_v48 = vld [vmem:[%s710_s1 + $0x98] sm:$0xff] }
  0x12   :  { %389 = vmatprep.subr.mxu1 %v81_v29  ;;  %355 = vmatpush3.msra.mxu0 %v33_v30  ;;  %v76_v49 = vld [vmem:[%s710_s1 + $0x198] sm:$0xff] }
  0x13   :  { %390 = vmatpush3.msra.mxu1 %v65_v31  ;;  %356 = vmatprep.subr.mxu0 %v48_v32 }
  0x14   :  { %391 = vmatprep.subr.mxu1 %v80_v33  ;;  %357 = vmatpush3.msra.mxu0 %v32_v34 }
  0x15   :  { %392 = vmatpush3.msra.mxu1 %v64_v35  ;;  %358 = vmatprep.subr.mxu0 %v47_v36 }
  0x16   :  { %393 = vmatprep.subr.mxu1 %v79_v37  ;;  %359 = vmatpush3.msra.mxu0 %v31_v38 }
  0x17   :  { %394 = vmatpush3.msra.mxu1 %v63_v39  ;;  %360 = vmatprep.subr.mxu0 %v46_v40 }
  0x18   :  { %395 = vmatprep.subr.mxu1 %v78_v41  ;;  %361 = vmatpush3.msra.mxu0 %v30_v42 }
  0x19   :  { %396 = vmatpush3.msra.mxu1 %v62_v43 }
  0x1a   :  { %10 = vsyncpa [#allocation3], 0  ;;  %362 = vmatprep.subr.mxu0 %v45_v44  ;;  %397 = vmatprep.subr.mxu1 %v77_v45  ;;  %v28_v50 = vld [vmem:[%s710_s1 + $0x18] sm:$0xff]  ;;  %v43_v52 = vld [vmem:[%s710_s1 + $0x90] sm:$0xff]  ;;  %v451_v4 = vmov 0.0   ;;  %vm452_vm0 = vmmov 0  }
  0x1b   :  { %v60_v51 = vld [vmem:[%s710_s1 + $0x118] sm:$0xff]  ;;  %363 = vmatpush3.msra.mxu0 %v29_v46  ;;  %398 = vmatpush3.msra.mxu1 %v61_v47  ;;  %v75_v53 = vld [vmem:[%s710_s1 + $0x190] sm:$0xff]  ;;  %v42_v56 = vld [vmem:[%s710_s1 + $0x88] sm:$0xff]  ;;  %vm248_vm1 = vcmask 261120   ;;  %s453_s13 = smov [#allocation2]  }
  0x1c   :  { %364 = vmatprep.subr.mxu0 %v44_v48  ;;  %399 = vmatprep.subr.mxu1 %v76_v49  ;;  %v27_v54 = vld [vmem:[%s710_s1 + $0x10] sm:$0xff]  ;;  %v74_v57 = vld [vmem:[%s710_s1 + $0x188] sm:$0xff]  ;;  %v41_v60 = vld [vmem:[%s710_s1 + $0x80] sm:$0xff]  ;;  %s329_s14 = sshll.u32 %s453_s13, 4  ;;  %s330_s14 = int_to_ptr.vmem [resolvable:$true] %s329_s14 }
  0x1d   :  { %v59_v55 = vld [vmem:[%s710_s1 + $0x110] sm:$0xff]  ;;  %365 = vmatpush3.msra.mxu0 %v28_v50  ;;  %400 = vmatpush3.msra.mxu1 %v60_v51  ;;  %v26_v58 = vld [vmem:[%s710_s1 + $0x8] sm:$0xff]  ;;  %v73_v61 = vld [vmem:[%s710_s1 + $0x180] sm:$0xff]  ;;  %p434_p1 = scmp.lt.s32.totalorder %s330_s14, %s330_s14 }
  0x1e   :  { %366 = vmatprep.subr.mxu0 %v43_v52  ;;  %401 = vmatprep.subr.mxu1 %v75_v53  ;;  %v58_v59 = vld [vmem:[%s710_s1 + $0x108] sm:$0xff]  ;;  %v25_v62 = vld [vmem:[%s710_s1] sm:$0xff]  ;;  %v24_v1 = vld [vmem:[%s709_s0 + $0x18] sm:$0xff] }
  0x1f   :  { %367 = vmatpush3.msra.mxu0 %v27_v54  ;;  %402 = vmatpush3.msra.mxu1 %v59_v55  ;;  %v22_v63 = vld [vmem:[%s709_s0 + $0x8] sm:$0xff]  ;;  %v57_v0 = vld [vmem:[%s710_s1 + $0x100] sm:$0xff]  ;;  %v23_v3 = vld [vmem:[%s709_s0 + $0x10] sm:$0xff] }
  0x20   :  { %368 = vmatprep.subr.mxu0 %v42_v56  ;;  %403 = vmatprep.subr.mxu1 %v74_v57  ;;  %v21_v2 = vld [vmem:[%s709_s0] sm:$0xff]  ;;  %v240_v5 = vld [vmem:[%s712_s3 + $0x18] sm:$0xff]  ;;  %v239_v6 = vld [vmem:[%s712_s3 + $0x10] sm:$0xff] }
  0x21   :  { %369 = vmatpush3.msra.mxu0 %v26_v58  ;;  %404 = vmatpush3.msra.mxu1 %v58_v59  ;;  %v238_v7 = vld [vmem:[%s712_s3 + $0x8] sm:$0xff]  ;;  %v237_v8 = vld [vmem:[%s712_s3] sm:$0xff] }
  0x22   :  { %370 = vmatprep.subr.mxu0 %v41_v60  ;;  %405 = vmatprep.subr.mxu1 %v73_v61  ;;  %v337_v11 = vld [vmem:[%s711_s2] ss:$0 sm:$0xff]  ;;  %s429_s2 = scalar_lea.vmem %s330_s14, 128 }
  0x23   :  { %371 = vmatpush3.msra.mxu0 %v25_v62  ;;  %160 = vmatprep.mubr.f32.mxu0 %v22_v63  ;;  %v338_v19 = vld [vmem:[%s713_s4] ss:$0 sm:$0xff]  ;;  %p430_p0 = scmp.ne.s32.totalorder %s330_s14, %s429_s2  ;;  %p435_p2 = scmp.lt.s32.totalorder %s429_s2, %s429_s2 }
  0x24   :  { %406 = vmatpush3.msra.mxu1 %v57_v0  ;;  %230 = vmatprep.mubr.f32.mxu1 %v24_v1 }
  0x25   :  { %161 = vmatmul.mubr.f32.vlgmr.msra.gmra.mxu0 %v21_v2  ;;  %231 = vmatmul.mubr.f32.vlgmr.msra.gmra.mxu1 %v23_v3  ;;  %p436_p3 = por %p435_p2, %p434_p1 }
  0x26   :  { %415 = vmatprep.subr.mxu0 %v451_v4  ;;  %423 = vmatprep.mubr.msk.f32.mxu0 %vm452_vm0, %v451_v4 }
  0x27   :  { %416 = vmatpush3.msra.mxu0 %v240_v5  ;;  %p437_p4 = pnand %p436_p3, %p430_p0 }
  0x28   :  { %417 = vmatprep.subr.mxu0 %v451_v4 }
  0x29   :  { %418 = vmatpush3.msra.mxu0 %v239_v6 }
  0x2a   :  { %419 = vmatprep.subr.mxu0 %v451_v4 }
  0x2b   :  { %420 = vmatpush3.msra.mxu0 %v238_v7 }
  0x2c   :  { %421 = vmatprep.subr.mxu0 %v451_v4 }
  0x2d   :  { %422 = vmatpush3.msra.mxu0 %v237_v8 }
  0xe5   :  { %v372_v9 = vpop.f32.mrf.mxu0  ;;  %v407_v10 = vpop.f32.mrf.mxu1 }
  0xe7   :  { %v373_v12 = vpop.f32.mrf.mxu0  ;;  %v408_v13 = vpop.f32.mrf.mxu1 }
  0xe8   :  { %v374_v14 = vadd.f32 %v373_v12, %v372_v9  ;;  %v409_v16 = vadd.f32 %v408_v13, %v407_v10 }
  0xea   :  { %v163_v15 = vadd.f32 %v374_v14, %v337_v11 }
  0xec   :  { %v233_v17 = vadd.f32 %v409_v16, %v163_v15 }
  0xee   :  { %v236_v18 = vmax.f32 %v233_v17, 0.0 }
  0xf0   :  { %424 = vmatmul.mubr.msk.f32.vlgmr.msra.gmra.mxu0 %vm248_vm1, %v236_v18 }
 0x1b0   :  { %v318_v20 = vpop.f32.mrf.mxu0 }
 0x1b1   :  { %v319_v21 = vadd.f32 %v338_v19, %v318_v20 }
 0x1b2   :  { %v425_v22 = vpop.f32.mrf.mxu0 }
 0x1b3   :  { %322 = vst [vmem:[#allocation2] sm:$0xff] %v319_v21 }
 0x1b4   :  { %440 = shalt.err (!%p437_p4)
}
 0x1b5   :  { %332 = dma.vmem_to_hbm [thread:$0]  %s330_s14, 128, %s714_s5, [#allocation3]  }
 0x1b6   :  { %449 = dma.done.wait [#allocation3], 128  }
 0x1b7   :  { %450 = vsyncadd [#allocation3], 4294967168 }
 0x1b8   :  { %336 = vsyncpa [#allocation3], 1 }

</bundles_post_ra>
